<compile_context>
chip_gen: v7x
topology: tpu7x:2x2x1
jax: 0.10.0
libtpu: 0.0.40
codegen_flags: <defaults>
</compile_context>

<pallas_src>
import math

import jax
import jax.numpy as jnp
from jax.experimental import pallas as pl
from jax.experimental.pallas import tpu as pltpu


def _cdiv(a, b):
    return -(-a // b)


def _round_up(x, m):
    return _cdiv(x, m) * m


def _vmem_capacity_bytes():
    try:
        return int(pltpu.get_tpu_info().vmem_capacity_bytes)
    except Exception:
        return 64 * 1024 * 1024  # most restrictive generation (v7x physical VMEM)


def _pick_tb(B, stream_row_bytes, fixed_bytes, plan_budget, cap_rows=8192):
    """Largest batch tile (multiple of 8 rows) whose double-buffered streamed
    footprint plus the resident weight stays inside the planning budget."""
    avail = max(plan_budget - fixed_bytes, stream_row_bytes * 16)
    tb = (avail // stream_row_bytes // 8) * 8
    tb = max(8, min(cap_rows, tb))
    b8 = _round_up(B, 8)
    tb = min(tb, b8)
    if tb >= b8 and b8 >= 1024:
        # v7x megacore: give the "parallel" batch axis at least 2 tiles when the
        # batch is big enough for the split to beat ~0.35us/grid-step overhead.
        tb = _round_up(_cdiv(b8, 2), 8)
    if tb >= B:
        tb = B  # single full-extent block (block dim == array dim, always legal)
    return tb


def _choose_kblock(dim, target):
    """Tile for a weight-streamed dim: multiple of 128 that exactly divides the
    128-padded dim, so zero-padding stays <= 127 columns."""
    pad = _round_up(dim, 128)
    n = pad // 128
    t = max(1, min(n, target // 128))
    while n % t:
        t -= 1
    return 128 * t, pad


# -------------------- kernels --------------------------------------------------

def _linear_kernel(x_ref, wt_ref, b_ref, o_ref):
    # Resident (D, O) weight; one MXU matmul per streamed batch tile.
    acc = jnp.dot(x_ref[...], wt_ref[...], preferred_element_type=jnp.float32)
    o_ref[...] = (acc + b_ref[...]).astype(o_ref.dtype)


def _linear_kernel_ktiled(x_ref, wt_ref, b_ref, o_ref, acc_ref):
    # grid = (batch tiles, O tiles, K tiles); K is the innermost reduction axis.
    @pl.when(pl.program_id(2) == 0)
    def _():
        acc_ref[...] = jnp.zeros_like(acc_ref)

    acc_ref[...] += jnp.dot(x_ref[...], wt_ref[...],
                            preferred_element_type=jnp.float32)

    @pl.when(pl.program_id(2) == pl.num_programs(2) - 1)
    def _():
        o_ref[...] = (acc_ref[...] + b_ref[...]).astype(o_ref.dtype)


# -------------------- pallas_call wrappers --------------------------------------

def _call_resident_weight(x, wt, b2, tb, vmem_limit):
    B, D = x.shape
    O = wt.shape[1]
    grid = (_cdiv(B, tb),)
    return pl.pallas_call(
        _linear_kernel,
        out_shape=jax.ShapeDtypeStruct((B, O), x.dtype),
        grid_spec=pltpu.PrefetchScalarGridSpec(
            num_scalar_prefetch=0,
            grid=grid,
            in_specs=[
                pl.BlockSpec((tb, D), lambda i: (i, 0)),   # streamed x tiles
                pl.BlockSpec((D, O), lambda i: (0, 0)),    # resident W^T
                pl.BlockSpec((1, O), lambda i: (0, 0)),    # resident bias row
            ],
            out_specs=pl.BlockSpec((tb, O), lambda i: (i, 0)),
        ),
        compiler_params=pltpu.CompilerParams(
            dimension_semantics=("parallel",),
            vmem_limit_bytes=vmem_limit),
        cost_estimate=pl.CostEstimate(
            flops=2 * B * D * O,
            transcendentals=0,
            bytes_accessed=4 * (B * D + D * O + O + B * O)),
    )(x, wt, b2)


def _call_ktiled(x, wt, b2, tb, tk, to, vmem_limit, out_cols):
    B, Dp = x.shape
    Op = wt.shape[1]
    grid = (_cdiv(B, tb), Op // to, Dp // tk)
    return pl.pallas_call(
        _linear_kernel_ktiled,
        out_shape=jax.ShapeDtypeStruct((B, out_cols), x.dtype),
        grid_spec=pltpu.PrefetchScalarGridSpec(
            num_scalar_prefetch=0,
            grid=grid,
            in_specs=[
                pl.BlockSpec((tb, tk), lambda i, j, k: (i, k)),
                pl.BlockSpec((tk, to), lambda i, j, k: (k, j)),
                pl.BlockSpec((1, to), lambda i, j, k: (0, j)),
            ],
            out_specs=pl.BlockSpec((tb, to), lambda i, j, k: (i, j)),
            scratch_shapes=[pltpu.VMEM((tb, to), jnp.float32)],
        ),
        compiler_params=pltpu.CompilerParams(
            dimension_semantics=("parallel", "parallel", "arbitrary"),
            vmem_limit_bytes=vmem_limit),
        cost_estimate=pl.CostEstimate(
            flops=2 * B * Dp * Op,
            transcendentals=0,
            bytes_accessed=4 * (B * Dp + Dp * Op + Op + B * out_cols)),
    )(x, wt, b2)


# -------------------- public forward --------------------------------------------

def linear_regression_forward(x, weight, bias, *,
                              block_b=None, block_k=None, block_o=None):
    """y = x @ weight.T + bias (PyTorch nn.Linear semantics).

    x: (B, D) f32; weight: (O, D) f32 (PyTorch layout); bias: (O,) -> (B, O).
    block_* override the auto tile choice (mainly to exercise tiled paths in tests).
    """
    B, D = x.shape
    O = weight.shape[0]
    cap = _vmem_capacity_bytes()
    plan_budget = int(cap * 0.45)
    vmem_limit = min(int(cap * 0.9), 120 * 1024 * 1024)

    # ---- O == 1, small-D fast path: lane-pack r = 128//D rows per VMEM row ----
    # x.reshape(B//r, r*D) is a free metadata reshape of the contiguous array, so
    # every streamed VMEM row is lane-dense (full 128 lanes, 512B DMA rows) instead
    # of D/128 occupied.  The weight becomes a tiny block-diagonal (r*D, r) matrix
    # and the kernel is the same resident-weight matmul kernel (idle MXU, no
    # cross-lane reduce / relayout); output keeps batch on the sublane axis.
    r = 128 // D if 0 < D < 128 and 128 % D == 0 else 0
    if (block_k is None and block_o is None and O == 1 and r > 1 and B % r == 0):
        xp = x.reshape(B // r, r * D)
        eye = jnp.eye(r, dtype=weight.dtype)
        wp = (eye[:, None, :] * jnp.reshape(weight, (1, D, 1))).reshape(r * D, r)
        bp = jnp.tile(bias.reshape(1, 1), (1, r))
        row_bytes = 4 * (128 + 128) * 2          # lane-padded x row + out row, x2 bufs
        fixed = 2 * 128 * 128 * 4                # resident packed weight
        tb = block_b if block_b is not None else _pick_tb(B // r, row_bytes,
                                                          fixed, plan_budget)
        out = _call_resident_weight(xp, wp, bp, tb, vmem_limit)   # (B//r, r)
        return out.reshape(B, 1)

    wt = jnp.transpose(weight)                   # (D, O) once, in the wrapper
    b2 = bias.reshape(1, O)
    d_lane = _round_up(D, 128)
    o_lane = _round_up(O, 128)
    wt_resident = 2 * _round_up(D, 8) * o_lane * 4

    force_tiled = (block_k is not None) or (block_o is not None)
    if not force_tiled and wt_resident <= 8 * 1024 * 1024:
        # ---- resident-weight path: stream batch tiles only ----
        row_bytes = 4 * (d_lane + o_lane) * 2
        tb = block_b if block_b is not None else _pick_tb(B, row_bytes,
                                                          wt_resident, plan_budget)
        return _call_resident_weight(x, wt, b2, tb, vmem_limit)

    # ---- big-weight path: tile contraction (D) and output (O) dims ----
    tk, d_pad = _choose_kblock(D, block_k if block_k is not None else 512)
    to, o_pad = _choose_kblock(O, block_o if block_o is not None else 256)
    if d_pad != D:
        # TODO(synk): zero-padding D copies x once; for very large x prefer D a
        # multiple of 128 or mask the ragged k-block in-kernel instead.
        x = jnp.pad(x, ((0, 0), (0, d_pad - D)))
        wt = jnp.pad(wt, ((0, d_pad - D), (0, 0)))
    if o_pad != O:
        wt = jnp.pad(wt, ((0, 0), (0, o_pad - O)))
        b2 = jnp.pad(b2, ((0, 0), (0, o_pad - O)))
    row_bytes = 4 * (tk + to) * 2 + 4 * to       # x + out (double-buffered) + acc
    fixed = 2 * tk * to * 4 + 2 * 8 * to * 4     # W^T tile buffers + bias
    tb = block_b if block_b is not None else _pick_tb(B, row_bytes, fixed, plan_budget)
    return _call_ktiled(x, wt, b2, tb, tk, to, vmem_limit, O)


def init_params(key, input_dim, output_dim=1):
    """Xavier-uniform weight (matches torch.nn.init.xavier_uniform_) plus
    PyTorch's default bias init U(-1/sqrt(fan_in), 1/sqrt(fan_in))."""
    wkey, bkey = jax.random.split(key)
    bound_w = math.sqrt(6.0 / (input_dim + output_dim))
    weight = jax.random.uniform(
        wkey, (output_dim, input_dim), dtype=jnp.float32,
        minval=-bound_w, maxval=bound_w)
    bound_b = 1.0 / math.sqrt(input_dim)
    bias = jax.random.uniform(
        bkey, (output_dim,), dtype=jnp.float32,
        minval=-bound_b, maxval=bound_b)
    return weight, bias


if __name__ == "__main__":
    key = jax.random.PRNGKey(0)
    k1, k2, k3, k4, k5, k6, k7 = jax.random.split(key, 7)

    def check(y, y_ref, shape):
        jax.block_until_ready(y)
        assert y.shape == shape, (y.shape, shape)
        assert jnp.allclose(y, y_ref, atol=1e-4, rtol=1e-4)

    # --- module-default shapes (output_dim=1, lane-packed path) ---
    batch, input_dim = 8, 32
    x = jax.random.normal(k1, (batch, input_dim), dtype=jnp.float32)
    weight, bias = init_params(k2, input_dim, 1)
    y = linear_regression_forward(x, weight, bias)
    check(y, x @ weight.T + bias[None, :], (batch, 1))

    # --- larger batch, still single tile (packed path) ---
    x2 = jax.random.normal(k3, (300, input_dim), dtype=jnp.float32)
    y2 = linear_regression_forward(x2, weight, bias)
    check(y2, x2 @ weight.T + bias[None, :], (300, 1))

    # --- multi-tile packed path with ragged last tile (validates G >= 2) ---
    x3 = jax.random.normal(k4, (1280, input_dim), dtype=jnp.float32)
    y3 = linear_regression_forward(x3, weight, bias, block_b=128)
    check(y3, x3 @ weight.T + bias[None, :], (1280, 1))

    # --- general output_dim path (resident weight) ---
    w4, b4 = init_params(k5, input_dim, 4)
    y4 = linear_regression_forward(x, w4, b4)
    check(y4, x @ w4.T + b4[None, :], (batch, 4))

    # --- general path, multi-tile batch with ragged last tile ---
    y5 = linear_regression_forward(x2, w4, b4, block_b=128)
    check(y5, x2 @ w4.T + b4[None, :], (300, 4))

    # --- forced D/O-tiled path (accumulator kernel, padded K and O) ---
    x6 = jax.random.normal(k6, (64, 160), dtype=jnp.float32)
    w6, b6 = init_params(k7, 160, 192)
    y6 = linear_regression_forward(x6, w6, b6, block_k=128, block_o=128)
    check(y6, x6 @ w6.T + b6[None, :], (64, 192))

    print("KERNEL_OK")
</pallas_src>

<mosaic_0001>
module attributes {stable_mosaic.version = 11 : i64} {
  func.func @_linear_kernel(%arg0: i32, %arg1: memref<2x128xf32, #tpu.memory_space<vmem>>, %arg2: memref<128x4xf32, #tpu.memory_space<vmem>>, %arg3: memref<1x4xf32, #tpu.memory_space<vmem>>, %arg4: memref<2x4xf32, #tpu.memory_space<vmem>>) attributes {dimension_semantics = [#tpu.dimension_semantics<parallel>], iteration_bounds = array<i64: 1>, scalar_prefetch = 0 : i64, scratch_operands = 0 : i64, tpu.core_type = #tpu.core_type<tc>, window_params = [{transform_indices = @transform_0, window_bounds = array<i64: 2, 128>}, {pipeline_mode = #tpu.pipeline_mode<synchronous>, transform_indices = @transform_1, window_bounds = array<i64: 128, 4>}, {pipeline_mode = #tpu.pipeline_mode<synchronous>, transform_indices = @transform_2, window_bounds = array<i64: 1, 4>}, {transform_indices = @transform_3, window_bounds = array<i64: 2, 4>}]} {
    %c0 = arith.constant 0 : index
    %c0_0 = arith.constant 0 : index
    %0 = vector.load %arg1[%c0, %c0_0] : memref<2x128xf32, #tpu.memory_space<vmem>>, vector<2x128xf32>
    %c0_1 = arith.constant 0 : index
    %c0_2 = arith.constant 0 : index
    %1 = vector.load %arg2[%c0_1, %c0_2] : memref<128x4xf32, #tpu.memory_space<vmem>>, vector<128x4xf32>
    %cst = arith.constant dense<0.000000e+00> : vector<2x4xf32>
    %2 = tpu.matmul %0, %1, %cst {dimension_numbers = #tpu.dot_dimension_numbers<[1], [0], [0], [1], [0, 0, 1, 1], [], []>} : vector<2x128xf32>, vector<128x4xf32>, vector<2x4xf32> -> vector<2x4xf32>
    %c0_3 = arith.constant 0 : index
    %c0_4 = arith.constant 0 : index
    %3 = vector.load %arg3[%c0_3, %c0_4] : memref<1x4xf32, #tpu.memory_space<vmem>>, vector<1x4xf32>
    %4 = vector.broadcast %3 : vector<1x4xf32> to vector<2x4xf32>
    %5 = arith.addf %2, %4 : vector<2x4xf32>
    %c0_5 = arith.constant 0 : index
    %c0_6 = arith.constant 0 : index
    %6 = vector.load %arg4[%c0_5, %c0_6] : memref<2x4xf32, #tpu.memory_space<vmem>>, vector<2x4xf32>
    tpu.vector_store %arg4[%c0_5, %c0_6], %5 {strides = array<i32>} : memref<2x4xf32, #tpu.memory_space<vmem>>, vector<2x4xf32>,
    return
  }
  func.func @transform_0(%arg0: i32) -> (i32, i32) {
    %c0_i32 = arith.constant 0 : i32
    %c0_i32_0 = arith.constant 0 : i32
    return %arg0, %c0_i32 : i32, i32
  }
  func.func @transform_1(%arg0: i32) -> (i32, i32) {
    %c0_i32 = arith.constant 0 : i32
    %c0_i32_0 = arith.constant 0 : i32
    %c0_i32_1 = arith.constant 0 : i32
    return %c0_i32, %c0_i32_0 : i32, i32
  }
  func.func @transform_2(%arg0: i32) -> (i32, i32) {
    %c0_i32 = arith.constant 0 : i32
    %c0_i32_0 = arith.constant 0 : i32
    %c0_i32_1 = arith.constant 0 : i32
    return %c0_i32, %c0_i32_0 : i32, i32
  }
  func.func @transform_3(%arg0: i32) -> (i32, i32) {
    %c0_i32 = arith.constant 0 : i32
    %c0_i32_0 = arith.constant 0 : i32
    return %arg0, %c0_i32 : i32, i32
  }
}

</mosaic_0001>

<bundles_post_ra>
// kernel: tpu_custom_call.1
= control target key start
LH: loop header
LB: loop body
LE: loop exit
PB: predicated region body
PF: predicated region fallthrough
CT: control target
= control target key end

     0   :  { %v230_v3 = vmov 0.0|0.0   ;;  %vm231_vm0 = vmmov 0   ;;  %v232_v6 = vmov 0.0   ;;  %s320_s0 = inlined_call_operand.vmem [shape: f32[2,128], index: 0, kind: input, shape index: {}]   ;;  %s321_s1 = inlined_call_operand.vmem [shape: f32[128,4], index: 1, kind: input, shape index: {}]   ;;  %s322_s2 = inlined_call_operand.vmem [shape: f32[1,4], index: 2, kind: input, shape index: {}]   ;;  %s323_s3 = inlined_call_operand.hbm [shape: f32[2,4], index: 3, kind: output, shape index: {}]  }
   0x1   :  { %v16_v0 = vld [vmem:[%s321_s1] sm:$0xff]  ;;  %v17_v1 = vld [vmem:[%s321_s1 + $0x8] sm:$0xff]  ;;  %v18_v2 = vld [vmem:[%s321_s1 + $0x10] sm:$0xff]  ;;  %178 = vmatprep.subr.bf16.mxu0 %v230_v3  ;;  %175 = vmatprep.mubr.msk.f32.mxu0 %vm231_vm0, %v232_v6 }
   0x2   :  { %v179_v4 = vpack.c.bf16 %v17_v1, %v16_v0  ;;  %v19_v5 = vld [vmem:[%s321_s1 + $0x18] sm:$0xff]  ;;  %v20_v8 = vld [vmem:[%s321_s1 + $0x20] sm:$0xff]  ;;  %v21_v9 = vld [vmem:[%s321_s1 + $0x28] sm:$0xff] }
   0x3   :  { %v182_v7 = vpack.c.bf16 %v19_v5, %v18_v2 }
   0x4   :  { %180 = vmatpush3.bf16.msra.mxu0 %v179_v4 }
   0x5   :  { %181 = vmatprep.subr.bf16.mxu0 %v230_v3 }
   0x6   :  { %8 = vsyncpa [#allocation3], 0  ;;  %v185_v10 = vpack.c.bf16 %v21_v9, %v20_v8  ;;  %v22_v11 = vld [vmem:[%s321_s1 + $0x30] sm:$0xff]  ;;  %v23_v12 = vld [vmem:[%s321_s1 + $0x38] sm:$0xff]  ;;  %s233_s21 = smov [#allocation2]   ;;  %vm109_vm1 = vcmask 25600  }
   0x7   :  { %v188_v13 = vpack.c.bf16 %v23_v12, %v22_v11  ;;  %v24_v14 = vld [vmem:[%s321_s1 + $0x40] sm:$0xff]  ;;  %v25_v15 = vld [vmem:[%s321_s1 + $0x48] sm:$0xff]  ;;  %v26_v17 = vld [vmem:[%s321_s1 + $0x50] sm:$0xff]  ;;  %s117_s22 = sshll.u32 %s233_s21, 4  ;;  %s118_s22 = int_to_ptr.vmem [resolvable:$true] %s117_s22 }
   0x8   :  { %183 = vmatpush3.bf16.msra.mxu0 %v182_v7  ;;  %v191_v16 = vpack.c.bf16 %v25_v15, %v24_v14  ;;  %v27_v18 = vld [vmem:[%s321_s1 + $0x58] sm:$0xff]  ;;  %v28_v20 = vld [vmem:[%s321_s1 + $0x60] sm:$0xff]  ;;  %v29_v21 = vld [vmem:[%s321_s1 + $0x68] sm:$0xff]  ;;  %p211_p1 = scmp.lt.s32.totalorder %s118_s22, %s118_s22 }
   0x9   :  { %184 = vmatprep.subr.bf16.mxu0 %v230_v3  ;;  %v194_v19 = vpack.c.bf16 %v27_v18, %v26_v17  ;;  %v197_v22 = vpack.c.bf16 %v29_v21, %v28_v20  ;;  %v30_v23 = vld [vmem:[%s321_s1 + $0x70] sm:$0xff]  ;;  %v31_v24 = vld [vmem:[%s321_s1 + $0x78] sm:$0xff]  ;;  %v15_v26 = vld [vmem:[%s320_s0] sm:$0x3]  ;;  %s206_s1 = scalar_lea.vmem %s118_s22, 32 }
   0xa   :  { %v200_v25 = vpack.c.bf16 %v31_v24, %v30_v23  ;;  %v125_v27 = vld [vmem:[%s322_s2] ss:$0 sm:$0xff]  ;;  %p207_p0 = scmp.ne.s32.totalorder %s118_s22, %s206_s1  ;;  %p212_p2 = scmp.lt.s32.totalorder %s206_s1, %s206_s1 }
   0xc   :  { %186 = vmatpush3.bf16.msra.mxu0 %v185_v10  ;;  %p213_p3 = por %p212_p2, %p211_p1 }
   0xd   :  { %187 = vmatprep.subr.bf16.mxu0 %v230_v3 }
   0xe   :  { %p214_p4 = pnand %p213_p3, %p207_p0 }
  0x10   :  { %189 = vmatpush3.bf16.msra.mxu0 %v188_v13 }
  0x11   :  { %190 = vmatprep.subr.bf16.mxu0 %v230_v3 }
  0x14   :  { %192 = vmatpush3.bf16.msra.mxu0 %v191_v16 }
  0x15   :  { %193 = vmatprep.subr.bf16.mxu0 %v230_v3 }
  0x18   :  { %195 = vmatpush3.bf16.msra.mxu0 %v194_v19 }
  0x19   :  { %196 = vmatprep.subr.bf16.mxu0 %v230_v3 }
  0x1c   :  { %198 = vmatpush3.bf16.msra.mxu0 %v197_v22 }
  0x1d   :  { %199 = vmatprep.subr.bf16.mxu0 %v230_v3 }
  0x20   :  { %201 = vmatpush3.bf16.msra.mxu0 %v200_v25 }
  0x23   :  { %176 = vmatmul.mubr.f32.vlgmr.msra.gmra.mrb[0].mxu0 %v15_v26 }
  0xf6   :  { %v105_v28 = vpop.f32.mrb[0].mxu0 }
  0xf7   :  { %v106_v29 = vadd.f32 %v125_v27, %v105_v28  ;;  %v177_v30 = vpop.f32.mrb[1].mxu0 }
  0xf9   :  { %110 = vst.msk [vmem:[#allocation2] sm:$0x3] %vm109_vm1, %v106_v29 }
  0xfa   :  { %217 = shalt.err (!%p214_p4)
}
  0xfb   :  { %s218_s24 = scalar_lea.hbm %s323_s3, 32 }
  0xfc   :  { %p219_p5 = scmp.ne.s32.totalorder %s323_s3, %s218_s24  ;;  %p222_p6 = scmp.lt.u32.totalorder %s218_s24, %s323_s3 }
  0xfe   :  { %p224_p7 = pnand %p222_p6, %p219_p5 }
 0x100   :  { %227 = shalt.err (!%p224_p7)
}
 0x101   :  { %120 = dma.vmem_to_hbm [thread:$0]  %s118_s22, 32, %s323_s3, [#allocation3]  }
 0x102   :  { %228 = dma.done.wait [#allocation3], 32  }
 0x103   :  { %229 = vsyncadd [#allocation3], 4294967264 }
 0x104   :  { %124 = vsyncpa [#allocation3], 1 }

</bundles_post_ra>
